<compile_context>
chip_gen: v6e
topology: v6e:2x2x1
jax: 0.10.0
libtpu: 0.0.40
codegen_flags: <defaults>
</compile_context>

<pallas_src>
import functools
import math

import jax
import jax.numpy as jnp
from jax.experimental import pallas as pl
from jax.experimental.pallas import tpu as pltpu

_LANE = 128
_SUBLANE = 8
# 1 / -(exp(-2) - 1) from the PyTorch module, folded at compile time.
_INV_DECAY_SCALE = 1.0 / (1.0 - math.exp(-2.0))


def _compute_envelope(params_ref, row0, shape, *, total_time, lane, eps):
    """Batch-invariant ADSR envelope for one (1, row_tile, lane) tile."""
    a = params_ref[0]
    h = params_ref[1]
    d = params_ref[2]
    s = params_ref[3]
    r = params_ref[4]

    # Scalar precompute (scalar unit) -> no per-element vector divides.
    inv_a = 1.0 / (a + eps)
    ah = a + h
    inv_d = 1.0 / (d + eps)
    decay_gain = jnp.float32(_INV_DECAY_SCALE) * (1.0 - s)
    # TODO(synk): reference divides by r with no eps; r == 0 yields inf/NaN in
    # both reference and kernel (kept for semantic fidelity).
    s_over_r = s / r
    rel_start = 1.0 - r

    inv_t = 1.0 / (total_time - 1) if total_time > 1 else 0.0   # compile time
    row_step = float(lane) * inv_t                               # compile time

    row_iota = jax.lax.broadcasted_iota(jnp.int32, shape, 1).astype(jnp.float32)
    col_iota = jax.lax.broadcasted_iota(jnp.int32, shape, 2).astype(jnp.float32)
    row_base = row0.astype(jnp.float32) * jnp.float32(row_step)  # scalar
    t = row_iota * jnp.float32(row_step) + (col_iota * jnp.float32(inv_t) + row_base)

    # attack: linear ramp 0 -> 1 over [0, a]
    attack_curve = jnp.minimum(t * inv_a, 1.0)
    # decay: exponential fall 1 -> sustain over [a+h, a+h+d]
    decay_lin = jnp.clip((t - ah) * inv_d, 0.0, 1.0)
    decay_curve = (jnp.exp(decay_lin * -2.0) - 1.0) * decay_gain
    # release: linear fall over [1-r, 1]
    release_curve = -jnp.clip((t - rel_start) * s_over_r, 0.0, 1.0)

    # attack <= 1, decay <= 0, release <= 0  =>  sum <= 1, so only the lower
    # bound of the reference's clamp(0, 1) can ever bind (s in [0, 1]).
    return jnp.maximum(attack_curve + decay_curve + release_curve, 0.0)


def _amp_env_kernel(params_ref, audio_ref, out_ref, env_ref, *,
                    total_time, lane, eps, time_axis, batch_axis, cache_env):
    """out = audio * envelope for one (1, row_tile, lane) tile.

    params_ref: SMEM (5,) f32 -> [attack, hold, decay, sustain, release]
    audio_ref / out_ref: VMEM (1, row_tile, lane)
    env_ref: VMEM (1, row_tile, lane) f32 scratch (envelope cache).
    """
    row_tile = audio_ref.shape[1]
    row0 = pl.program_id(time_axis) * row_tile
    if cache_env:
        # Envelope is batch-invariant: compute once per time block (first
        # batch row) and reuse the VMEM-cached tile for every other row.
        @pl.when(pl.program_id(batch_axis) == 0)
        def _():
            env_ref[...] = _compute_envelope(
                params_ref, row0, audio_ref.shape,
                total_time=total_time, lane=lane, eps=eps)
        env = env_ref[...]
    else:
        env = _compute_envelope(params_ref, row0, audio_ref.shape,
                                total_time=total_time, lane=lane, eps=eps)
    out_ref[...] = (audio_ref[...] * env).astype(out_ref.dtype)


def _pick_row_tile(rows: int, lane: int, itemsize: int, target_bytes: int) -> int:
    """Multiple-of-8 row tile dividing `rows` (rows is a multiple of 8)."""
    cap = max(_SUBLANE, (target_bytes // (lane * itemsize)) // _SUBLANE * _SUBLANE)
    if rows >= 2 * _SUBLANE:
        # Keep >= 2 time blocks: feeds both v7x TensorCores and lets the
        # envelope cache amortize across the batch within each block.
        cap = min(cap, (rows // 2) // _SUBLANE * _SUBLANE)
    rt = min(rows, cap)
    rt = max(_SUBLANE, (rt // _SUBLANE) * _SUBLANE)
    while rows % rt != 0:
        rt -= _SUBLANE
    return rt


def amp_envelope_forward(audio: jax.Array, params: jax.Array, *,
                         eps: float = 1e-5,
                         target_block_bytes: int = 4 << 20) -> jax.Array:
    """audio: (batch, time) float; params: (5,) f32 = [a, h, d, s, r]."""
    B, T = audio.shape
    params = params.astype(jnp.float32)

    # Pad time to a multiple of 8*128 so every block is sublane/lane dense
    # (unmasked vst) and the VMEM footprint stays bounded for any T; the pad
    # region is multiplied against zero-padded audio and sliced off below.
    chunk = _SUBLANE * _LANE
    t_pad = pl.cdiv(T, chunk) * chunk
    x = audio if t_pad == T else jnp.pad(audio, ((0, 0), (0, t_pad - T)))

    rows = t_pad // _LANE
    row_tile = _pick_row_tile(rows, _LANE, x.dtype.itemsize, target_block_bytes)
    time_blocks = rows // row_tile
    x = x.reshape(B, rows, _LANE)

    block = (1, row_tile, _LANE)
    cache_env = time_blocks >= 2
    if cache_env:
        # Time-outer ("parallel": shards across v7x TCs), batch-inner
        # ("arbitrary": ordered, so the cached envelope tile stays valid).
        grid = (time_blocks, B)
        index_map = lambda j, b, p: (b, j, 0)
        time_axis, batch_axis = 0, 1
        semantics = ("parallel", "arbitrary")
    else:
        # Degenerate tiny-T case (single time block): go batch-parallel and
        # recompute the one envelope tile per batch row.
        grid = (B, time_blocks)
        index_map = lambda b, j, p: (b, j, 0)
        time_axis, batch_axis = 1, 0
        semantics = ("parallel", "parallel")

    kernel = functools.partial(
        _amp_env_kernel, total_time=T, lane=_LANE, eps=eps,
        time_axis=time_axis, batch_axis=batch_axis, cache_env=cache_env)

    out = pl.pallas_call(
        kernel,
        out_shape=jax.ShapeDtypeStruct((B, rows, _LANE), x.dtype),
        grid_spec=pltpu.PrefetchScalarGridSpec(
            num_scalar_prefetch=1,
            grid=grid,
            in_specs=[pl.BlockSpec(block, index_map)],
            out_specs=pl.BlockSpec(block, index_map),
            scratch_shapes=[pltpu.VMEM(block, jnp.float32)],
        ),
        compiler_params=pltpu.CompilerParams(
            dimension_semantics=semantics,
            vmem_limit_bytes=40 << 20,
        ),
    )(params, x)
    return out.reshape(B, t_pad)[:, :T]


def _reference(audio, params, eps=1e-5):
    a, h, d, s, r = [params[i] for i in range(5)]
    B, T = audio.shape
    t = jnp.broadcast_to(jnp.linspace(0.0, 1.0, T)[None, :], (B, T))
    attack_curve = jnp.minimum(t / (a + eps), 1.0)
    decay_curve = jnp.clip((t - (a + h)) / (d + eps), 0.0, 1.0)
    decay_curve = (jnp.exp(-decay_curve * 2.0) - 1.0) / -(math.exp(-2.0) - 1.0) * (1.0 - s)
    release_curve = -jnp.clip((t - (1.0 - r)) * s / r, 0.0, 1.0)
    env = jnp.clip(attack_curve + decay_curve + release_curve, 0.0, 1.0)
    return audio * env


if __name__ == "__main__":
    key = jax.random.PRNGKey(0)
    batch, time = 2, 512
    audio = jax.random.normal(key, (batch, time), dtype=jnp.float32)

    # ADSR params (deterministic, valid: a+h+d+r <= 1, 0 <= s <= 1).
    params = jnp.array([0.1, 0.1, 0.2, 0.6, 0.3], dtype=jnp.float32)

    out = jax.block_until_ready(amp_envelope_forward(audio, params))
    ref = _reference(audio, params)
    assert out.shape == (batch, time) and out.dtype == jnp.float32
    assert jnp.allclose(out, ref, atol=1e-5, rtol=1e-5)

    # Cached-envelope path (time-outer grid, batch-inner reuse), default blocks.
    audio2 = jax.random.normal(jax.random.PRNGKey(1), (batch, 8192), dtype=jnp.float32)
    out2 = jax.block_until_ready(amp_envelope_forward(audio2, params))
    assert jnp.allclose(out2, _reference(audio2, params), atol=1e-5, rtol=1e-5)

    # Same data with tiny blocks -> many time blocks, multi-step pipelining.
    out2b = jax.block_until_ready(
        amp_envelope_forward(audio2, params, target_block_bytes=_SUBLANE * _LANE * 4))
    assert jnp.allclose(out2b, _reference(audio2, params), atol=1e-5, rtol=1e-5)

    # Non-multiple-of-128 clip length -> wrapper-side padding + slice-back.
    audio3 = jax.random.normal(jax.random.PRNGKey(2), (batch, 1000), dtype=jnp.float32)
    out3 = jax.block_until_ready(amp_envelope_forward(audio3, params))
    assert jnp.allclose(out3, _reference(audio3, params), atol=1e-5, rtol=1e-5)

    print("KERNEL_OK")
</pallas_src>

<mosaic_0001>
module attributes {stable_mosaic.version = 11 : i64} {
  func.func @_amp_env_kernel(%arg0: i32, %arg1: i32, %arg2: memref<5xf32, #tpu.memory_space<smem>>, %arg3: memref<1x8x128xf32, #tpu.memory_space<vmem>>, %arg4: memref<1x8x128xf32, #tpu.memory_space<vmem>>, %arg5: memref<1x8x128xf32, #tpu.memory_space<vmem>>) attributes {dimension_semantics = [#tpu.dimension_semantics<parallel>, #tpu.dimension_semantics<parallel>], iteration_bounds = array<i64: 2, 1>, scalar_prefetch = 1 : i64, scratch_operands = 1 : i64, tpu.core_type = #tpu.core_type<tc>, window_params = [{transform_indices = @transform_0, window_bounds = array<i64: 1, 8, 128>}, {transform_indices = @transform_1, window_bounds = array<i64: 1, 8, 128>}]} {
    %c8_i32 = arith.constant 8 : i32
    %0 = arith.muli %arg1, %c8_i32 : i32
    %c0 = arith.constant 0 : index
    %1 = memref.load %arg2[%c0] : memref<5xf32, #tpu.memory_space<smem>>
    %c1 = arith.constant 1 : index
    %2 = memref.load %arg2[%c1] : memref<5xf32, #tpu.memory_space<smem>>
    %c2 = arith.constant 2 : index
    %3 = memref.load %arg2[%c2] : memref<5xf32, #tpu.memory_space<smem>>
    %c3 = arith.constant 3 : index
    %4 = memref.load %arg2[%c3] : memref<5xf32, #tpu.memory_space<smem>>
    %c4 = arith.constant 4 : index
    %5 = memref.load %arg2[%c4] : memref<5xf32, #tpu.memory_space<smem>>
    %cst = arith.constant 9.99999974E-6 : f32
    %6 = arith.addf %1, %cst : f32
    %cst_0 = arith.constant 1.000000e+00 : f32
    %7 = arith.divf %cst_0, %6 : f32
    %8 = arith.addf %1, %2 : f32
    %cst_1 = arith.constant 9.99999974E-6 : f32
    %9 = arith.addf %3, %cst_1 : f32
    %cst_2 = arith.constant 1.000000e+00 : f32
    %10 = arith.divf %cst_2, %9 : f32
    %cst_3 = arith.constant 1.000000e+00 : f32
    %11 = arith.subf %cst_3, %4 : f32
    %cst_4 = arith.constant 1.15651762 : f32
    %12 = arith.mulf %cst_4, %11 : f32
    %13 = arith.divf %4, %5 : f32
    %cst_5 = arith.constant 1.000000e+00 : f32
    %14 = arith.subf %cst_5, %5 : f32
    %15 = tpu.iota {dimensions = array<i32: 1>} : vector<1x8x128xi32>
    %16 = arith.sitofp %15 : vector<1x8x128xi32> to vector<1x8x128xf32>
    %17 = tpu.iota {dimensions = array<i32: 2>} : vector<1x8x128xi32>
    %18 = arith.sitofp %17 : vector<1x8x128xi32> to vector<1x8x128xf32>
    %19 = arith.sitofp %0 : i32 to f32
    %cst_6 = arith.constant 0.250489235 : f32
    %20 = arith.mulf %19, %cst_6 : f32
    %cst_7 = arith.constant 0.250489235 : f32
    %21 = vector.broadcast %cst_7 : f32 to vector<1x8x128xf32>
    %22 = arith.mulf %16, %21 : vector<1x8x128xf32>
    %cst_8 = arith.constant 0.00195694715 : f32
    %23 = vector.broadcast %cst_8 : f32 to vector<1x8x128xf32>
    %24 = arith.mulf %18, %23 : vector<1x8x128xf32>
    %25 = vector.broadcast %20 : f32 to vector<1x8x128xf32>
    %26 = arith.addf %24, %25 : vector<1x8x128xf32>
    %27 = arith.addf %22, %26 : vector<1x8x128xf32>
    %28 = vector.broadcast %7 : f32 to vector<1x8x128xf32>
    %29 = arith.mulf %27, %28 : vector<1x8x128xf32>
    %cst_9 = arith.constant 1.000000e+00 : f32
    %30 = vector.broadcast %cst_9 : f32 to vector<1x8x128xf32>
    %31 = arith.minimumf %29, %30 : vector<1x8x128xf32>
    %32 = vector.broadcast %8 : f32 to vector<1x8x128xf32>
    %33 = arith.subf %27, %32 : vector<1x8x128xf32>
    %34 = vector.broadcast %10 : f32 to vector<1x8x128xf32>
    %35 = arith.mulf %33, %34 : vector<1x8x128xf32>
    %cst_10 = arith.constant 0.000000e+00 : f32
    %cst_11 = arith.constant 1.000000e+00 : f32
    %36 = vector.broadcast %cst_10 : f32 to vector<1x8x128xf32>
    %37 = arith.maximumf %36, %35 : vector<1x8x128xf32>
    %38 = vector.broadcast %cst_11 : f32 to vector<1x8x128xf32>
    %39 = arith.minimumf %38, %37 : vector<1x8x128xf32>
    %cst_12 = arith.constant -2.000000e+00 : f32
    %40 = vector.broadcast %cst_12 : f32 to vector<1x8x128xf32>
    %41 = arith.mulf %39, %40 : vector<1x8x128xf32>
    %42 = math.exp %41 : vector<1x8x128xf32>
    %cst_13 = arith.constant 1.000000e+00 : f32
    %43 = vector.broadcast %cst_13 : f32 to vector<1x8x128xf32>
    %44 = arith.subf %42, %43 : vector<1x8x128xf32>
    %45 = vector.broadcast %12 : f32 to vector<1x8x128xf32>
    %46 = arith.mulf %44, %45 : vector<1x8x128xf32>
    %47 = vector.broadcast %14 : f32 to vector<1x8x128xf32>
    %48 = arith.subf %27, %47 : vector<1x8x128xf32>
    %49 = vector.broadcast %13 : f32 to vector<1x8x128xf32>
    %50 = arith.mulf %48, %49 : vector<1x8x128xf32>
    %cst_14 = arith.constant 0.000000e+00 : f32
    %cst_15 = arith.constant 1.000000e+00 : f32
    %51 = vector.broadcast %cst_14 : f32 to vector<1x8x128xf32>
    %52 = arith.maximumf %51, %50 : vector<1x8x128xf32>
    %53 = vector.broadcast %cst_15 : f32 to vector<1x8x128xf32>
    %54 = arith.minimumf %53, %52 : vector<1x8x128xf32>
    %cst_16 = arith.constant 0.000000e+00 : f32
    %55 = vector.broadcast %cst_16 : f32 to vector<1x8x128xf32>
    %56 = arith.subf %55, %54 : vector<1x8x128xf32>
    %57 = arith.addf %31, %46 : vector<1x8x128xf32>
    %58 = arith.addf %57, %56 : vector<1x8x128xf32>
    %cst_17 = arith.constant 0.000000e+00 : f32
    %59 = vector.broadcast %cst_17 : f32 to vector<1x8x128xf32>
    %60 = arith.maximumf %58, %59 : vector<1x8x128xf32>
    %c0_18 = arith.constant 0 : index
    %c0_19 = arith.constant 0 : index
    %c0_20 = arith.constant 0 : index
    %61 = vector.load %arg3[%c0_18, %c0_19, %c0_20] : memref<1x8x128xf32, #tpu.memory_space<vmem>>, vector<1x8x128xf32>
    %62 = arith.mulf %61, %60 : vector<1x8x128xf32>
    %c0_21 = arith.constant 0 : index
    %c0_22 = arith.constant 0 : index
    %c0_23 = arith.constant 0 : index
    %63 = vector.load %arg4[%c0_21, %c0_22, %c0_23] : memref<1x8x128xf32, #tpu.memory_space<vmem>>, vector<1x8x128xf32>
    tpu.vector_store %arg4[%c0_21, %c0_22, %c0_23], %62 {strides = array<i32>} : memref<1x8x128xf32, #tpu.memory_space<vmem>>, vector<1x8x128xf32>,
    return
  }
  func.func @transform_0(%arg0: i32, %arg1: i32, %arg2: memref<5xf32, #tpu.memory_space<smem>>) -> (i32, i32, i32) {
    %c0_i32 = arith.constant 0 : i32
    %c0_i32_0 = arith.constant 0 : i32
    return %arg0, %arg1, %c0_i32 : i32, i32, i32
  }
  func.func @transform_1(%arg0: i32, %arg1: i32, %arg2: memref<5xf32, #tpu.memory_space<smem>>) -> (i32, i32, i32) {
    %c0_i32 = arith.constant 0 : i32
    %c0_i32_0 = arith.constant 0 : i32
    return %arg0, %arg1, %c0_i32 : i32, i32, i32
  }
}

</mosaic_0001>

<bundles_post_ra>
// kernel: tpu_custom_call.1
= control target key start
LH: loop header
LB: loop body
LE: loop exit
PB: predicated region body
PF: predicated region fallthrough
CT: control target
= control target key end

     0   :  { %s527_s9 = smov [#allocation4]   ;;  %s693_s0 = inlined_call_operand.hbm [shape: f32[5], index: 0, kind: input, shape index: {}]   ;;  %s694_s1 = inlined_call_operand.hbm [shape: f32[2,8,128], index: 1, kind: input, shape index: {}]   ;;  %s695_s2 = inlined_call_operand.hbm [shape: f32[2,8,128], index: 2, kind: output, shape index: {}]  }
   0x1   :  { %8 = dma.hbm_to_smem %s693_s0, 16, %s527_s9, [#allocation3] }
   0x2   :  { %493 = dma.done.wait [#allocation3], 16 }
   0x3   :  { %494 = vsyncadd [#allocation3], 4294967280 }
   0x4   :  { %10 = sfence }
   0x5   :  { %11 = vsyncpa [#allocation6], 0 }
   0x6   :  { %13 = vsyncpa [#allocation6 + $0x1], 0 }
   0x7   :  { %14 = vsyncpa [#allocation7], 0 }
   0x8   :  { %16 = vsyncpa [#allocation7 + $0x1], 0  ;;  %s548_s12 = smov 0   ;;  %s550_s13 = smov 0  }
   0x9   :  { %s552_s14 = smov 0   ;;  %s554_s15 = smov 0  }
   0xa   :  { %s556_s16 = smov 0   ;;  %s558_s17 = smov 0  }
   0xb LB: > { %s312_s0 = sadd.s32 4294967295, %s525_s17   ;;  %s313_s18 = sadd.s32 4294967294, %s525_s17   ;;  %s525_s17 = sphi %s558_s17, %s22_s17   ;;  %s521_s16 = sphi %s556_s16, %s707_s16   ;;  %s517_s15 = sphi %s554_s15, %s706_s15   ;;  %s513_s14 = sphi %s552_s14, %s705_s14   ;;  %s509_s13 = sphi %s550_s13, %s704_s13   ;;  %s505_s12 = sphi %s548_s12, %s703_s12  }
   0xc   : > { %s34_s19 = sadd.s32 1, %s521_s16  ;;  %s43_s20 = sadd.s32 1, %s513_s14 }
   0xd   : > { %p36_p0 = scmp.ge.s32.totalorder %s34_s19, 2  ;;  %p50_p1 = scmp.ne.s32.totalorder %s513_s14, %s509_s13 }
   0xe   : > { %p51_p2 = scmp.eq.s32.totalorder %s525_s17, 0  ;;  %p56_p3 = scmp.ne.s32.totalorder %s509_s13, %s505_s12 }
   0xf   : > { %s709_s19 = smov (%p36_p0, %s34_s19), 0  ;;  %p57_p5 = scmp.eq.s32.totalorder %s312_s0, 0 }
  0x10   : > { %p589_p4 = por %p51_p2, %p50_p1  ;;  %s38_s22 = ssub.s32 %s521_s16, %s709_s19 }
  0x11   : > { %p82_p6 = scmp.eq.s32.totalorder %s312_s0, 1  ;;  %p41_p7 = scmp.eq.s32.totalorder %s38_s22, 0 }
  0x12   : > { %p595_p8 = por %p57_p5, %p56_p3  ;;  %p88_p10 = scmp.eq.s32.totalorder %s313_s18, 1 }
  0x13   : > { %p599_p9 = por %p82_p6, %p50_p1  ;;  %p348_p13 = scmp.lt.s32.totalorder %s525_s17, 2 }
  0x14   : > { %s604_s25 = scalar_select %p41_p7, %s513_s14, %s43_s20  }
  0x15   : > { %p606_p11 = por %p88_p10, %p56_p3  ;;  %s108_s27 = sand.u32 1, %s513_s14  }
  0x16   : > { %s316_s28 = sshll.u32 %s108_s27, 3  ;;  %s317_s29 = sshll.u32 %s521_s16, 7 }
  0x17   : > { %s699_s26 = scalar_select %p606_p11, 1, 0 }
  0x18   : > { %s118_s4 = scalar_lea.hbm %s694_s1, %s317_s29  ;;  %s112_s5 = scalar_lea.vmem [#allocation5], %s316_s28 }
  0x19   : > { %s120_s6 = sshll.u32 %s112_s5, 4  ;;  %p619_p0 = pnand %p348_p13, %p589_p4  ;;  %s121_s6 = int_to_ptr.vmem [resolvable:$true] %s120_s6 }
  0x1a   : > { %p318_p1 = scmp.ge.s32.totalorder %s525_s17, 1  ;;  %p125_p2 = scmp.lt.s32.totalorder %s525_s17, 3 }
  0x1b   : > { %s109_s8 = scalar_lea.sflag [#allocation6], %s108_s27  ;;  %p417_p3 = pneg %p619_p0 }
  0x1c   : > { %s428_s9 = scalar_lea.vmem %s121_s6, 128  ;;  %s528_s10 = smov [#allocation5]  }
  0x1d   : > { %p429_p5 = scmp.ne.s32.totalorder %s121_s6, %s428_s9  ;;  %s433_s11 = sshll.u32 %s528_s10, 4  ;;  %s434_s11 = int_to_ptr.vmem [resolvable:$false] %s433_s11 }
  0x1e   : > { %s435_s0 = scalar_lea.vmem %s434_s11, 256  ;;  %p436_p10 = scmp.lt.s32.totalorder %s121_s6, %s434_s11 }
  0x1f   : > { %p431_p6 = pnand %p429_p5, %p417_p3  ;;  %p437_p12 = scmp.lt.s32.totalorder %s435_s0, %s428_s9 }
  0x21   : > { %p432_p7 = pneg %p431_p6  ;;  %p438_p4 = por %p437_p12, %p436_p10 }
  0x23   : > { %p439_p13 = pnand %p438_p4, %p432_p7 }
  0x25   : > { %442 = shalt.err (!%p439_p13)
}
  0x26   : > { %343 = dma.hbm_to_vmem [thread:$0]  (!%p619_p0), %s118_s4, 128, %s121_s6, %s109_s8  }
  0x27   : > { %p126_p11 = pnand %p318_p1, %p125_p2 }
  0x28   : > { %s634_s18 = sand.u32 (!%p126_p11), 1, %s509_s13  }
  0x29   : > { %129 = sbr.rel (%p126_p11) target bundleno = 173 (0xad), region = 24  ;;  %s319_s20 = sshll.u32 (!%p126_p11), %s634_s18, 3 }
  0x2a   : > { %s132_s21 = scalar_lea.sflag (!%p126_p11), [#allocation6], %s634_s18  ;;  %s640_s22 = scalar_lea.vmem (!%p126_p11), [#allocation5], %s319_s20 }
  0x2e   : > { %496 = dma.done.wait (%p595_p8), %s132_s21, 128  }
  0x2f   : > { %498 = vsyncadd (%p595_p8), %s132_s21, 4294967168  ;;  %s322_s27 = sld [smem:[#allocation4 + $0x2]]  ;;  %v176_v6 = vlaneseq  ;;  %v214_v38 = vld [vmem:[%s640_s22] sm:$0xff]  ;;  %s327_s21 = sshll.u32 %s517_s15, 7 }
  0x30   : > { %s646_s28 = sld [smem:[#allocation4 + $0x4]] }
  0x31   : > { %s155_s29 = sld [smem:[#allocation4]]  ;;  %v177_v7 = vshrl.u32 %v176_v6, 7  ;;  %v180_v8 = vand.u32 127, %v176_v6 }
  0x32   : > { %s321_s23 = sld [smem:[#allocation4 + $0x1]] }
  0x33   : > { %v178_v9 = vcvt.s32.f32 %v177_v7  ;;  %v181_v10 = vcvt.s32.f32 %v180_v8  ;;  %s323_s7 = sld [smem:[#allocation4 + $0x3]] }
  0x35   : > { %s165_s30 = sadd.f32 1e-05, %s322_s27  ;;  %v184_v11 = vmul.f32 0.25048923, %v178_v9  ;;  %v185_v12 = vmul.f32 0.0019569471, %v181_v10 }
  0x36   : > { %v171_v0 = vstv %s646_s28  ;;  %s175_s8 = ssub.f32 1.0, %s646_s28  ;;  %s153_s27 = scalar_lea.vmem [#allocation8], %s319_s20 }
  0x37   : > { %s160_s3 = sadd.f32 1e-05, %s155_s29  ;;  %v166_v1 = vstv %s165_s30  ;;  %399 = vrcp.f32 %v171_v0  ;;  %v188_v13 = vadd.f32 %v185_v12, %v184_v11  ;;  %s232_s28 = sshll.u32 %s153_s27, 4  ;;  %s233_s28 = int_to_ptr.vmem [resolvable:$true] %s232_s28 }
  0x38   : > { %401 = vrcp.f32 %v166_v1  ;;  %s164_s4 = sadd.f32 %s321_s23, %s155_s29  ;;  %v204_v21 = vstv %s175_s8  ;;  %s218_s23 = scalar_lea.sflag [#allocation7], %s634_s18 }
  0x39   : > { %v161_v2 = vstv %s160_s3  ;;  %v205_v23 = vsub.f32 %v188_v13, %v204_v21  ;;  %s169_s11 = ssub.f32 1.0, %s323_s7  ;;  %s230_s3 = scalar_lea.hbm %s695_s2, %s327_s21 }
  0x3a   : > { %403 = vrcp.f32 %v161_v2  ;;  %v192_v14 = vstv %s164_s4  ;;  %s443_s4 = scalar_lea.vmem %s233_s28, 128 }
  0x3b   : > { %v193_v15 = vsub.f32 %v188_v13, %v192_v14  ;;  %s170_s0 = smul.f32 1.1565176, %s169_s11  ;;  %p444_p8 = scmp.ne.s32.totalorder %s233_s28, %s443_s4 }
  0x3d   : > { %v202_v31 = vstv %s170_s0  ;;  %p445_p11 = pnand %p444_p8, %p599_p9 }
  0x3f   : > { %p446_p12 = pneg %p445_p11 }
  0x44   : > { %v400_v3 = vpop.eup %399 }
  0x45   : > { %v402_v4 = vpop.eup %401 }
  0x47   : > { %v404_v5 = vpop.eup %403 }
  0x48   : > { %330 = vpush %v404_v5 }
  0x49   : > { %332 = vpush %v402_v4 }
  0x4a   : > { %334 = vpush %v400_v3 }
  0x79   : > { %s331_s5 = spop %330 }
  0x7a   : > { %s333_s6 = spop %332  ;;  %v189_v27 = vstv %s331_s5  ;;  %s529_s5 = smov [#allocation8]  }
  0x7b   : > { %v194_v16 = vstv %s333_s6  ;;  %s335_s9 = spop %334  ;;  %v190_v28 = vmul.f32 %v189_v27, %v188_v13  ;;  %s447_s22 = sshll.u32 %s529_s5, 4  ;;  %s448_s22 = int_to_ptr.vmem [resolvable:$false] %s447_s22 }
  0x7c   : > { %v195_v17 = vmul.f32 %v194_v16, %v193_v15  ;;  %s174_s10 = smul.f32 %s335_s9, %s323_s7  ;;  %s449_s15 = scalar_lea.vmem %s448_s22, 256 }
  0x7d   : > { %v191_v33 = vmin.f32 %v190_v28, 1.0  ;;  %p450_p0 = scmp.lt.s32.totalorder %s233_s28, %s448_s22  ;;  %p451_p1 = scmp.lt.s32.totalorder %s449_s15, %s443_s4 }
  0x7e   : > { %v196_v18 = vmax.f32 %v195_v17, 0.0  ;;  %v206_v24 = vstv %s174_s10 }
  0x7f   : > { %v207_v25 = vmul.f32 %v206_v24, %v205_v23  ;;  %p452_p2 = por %p451_p1, %p450_p0 }
  0x80   : > { %v197_v19 = vmin.f32 %v196_v18, 1.0 }
  0x81   : > { %v208_v26 = vmax.f32 %v207_v25, 0.0  ;;  %p453_p3 = pnand %p452_p2, %p446_p12 }
  0x82   : > { %v198_v20 = vmul.f32 -2.0, %v197_v19 }
  0x83   : > { %v209_v29 = vmin.f32 %v208_v26, 1.0 }
  0x84   : > { %v199_v22 = vmul.f32 1.442695, %v198_v20 }
  0x85   : > { %v210_v35 = vsub.f32 0.0, %v209_v29 }
  0x86   : > { %405 = vpow2.f32 %v199_v22 }
  0x93   : > { %v406_v30 = vpop.eup %405 }
  0x94   : > { %v325_v32 = vadd.f32 -1.0, %v406_v30 }
  0x96   : > { %v203_v34 = vmul.f32 %v325_v32, %v202_v31 }
  0x98   : > { %v211_v36 = vadd.f32 %v203_v34, %v191_v33 }
  0x9a   : > { %v212_v37 = vadd.f32 %v211_v36, %v210_v35 }
  0x9c   : > { %v213_v39 = vmax.f32 %v212_v37, 0.0 }
  0x9e   : > { %v215_v40 = vmul.f32 %v214_v38, %v213_v39 }
  0xa0   : > { %216 = vst [vmem:[%s153_s27] sm:$0xff] %v215_v40 }
  0xa1   : > { %456 = shalt.err (!%p453_p3)
}
  0xa2   : > { %s457_s20 = scalar_lea.hbm %s230_s3, 128  ;;  %s461_s7 = scalar_lea.hbm %s695_s2, 256 }
  0xa3   : > { %p458_p5 = scmp.ne.s32.totalorder %s230_s3, %s457_s20  ;;  %p462_p10 = scmp.lt.s32.totalorder %s230_s3, %s695_s2 }
  0xa4   : > { %p463_p4 = scmp.lt.s32.totalorder %s461_s7, %s457_s20 }
  0xa5   : > { %p459_p6 = pnand %p458_p5, %p599_p9 }
  0xa6   : > { %p464_p13 = por %p463_p4, %p462_p10 }
  0xa7   : > { %p460_p7 = pneg %p459_p6 }
  0xa9   : > { %p465_p8 = pnand %p464_p13, %p460_p7 }
  0xab   : > { %468 = shalt.err (!%p465_p8)
}
  0xac   : > { %338 = dma.vmem_to_hbm [thread:$0]  (%p599_p9), %s233_s28, 128, %s230_s3, %s218_s23  }
  0xad PF: > { %s244_s10 = sand.u32 1, %s505_s12   ;;  %p701_p11 = scmp.ne.s32.totalorder %s699_s26, 0 }
  0xae   : > { %p702_p12 = scmp.ge.s32.totalorder %s525_s17, 2  ;;  %s245_s11 = scalar_lea.sflag [#allocation7], %s244_s10 }
  0xb0   : > { %p345_p0 = pnand %p702_p12, %p701_p11 }
  0xb2   : > { %p346_p1 = pneg %p345_p0 }
  0xb4   : > { %500 = dma.done.wait (%p346_p1), %s245_s11, 128  }
  0xb5   : > { %502 = vsyncadd (%p346_p1), %s245_s11, 4294967168  ;;  %s22_s17 = sadd.s32 1, %s525_s17   ;;  %s703_s12 = smov %s509_s13 }
  0xb6   : > { %p19_p2 = scmp.ge.s32.totalorder %s22_s17, 4   ;;  %s704_s13 = smov %s513_s14 }
  0xb7   : > { %s705_s14 = smov %s604_s25  ;;  %s706_s15 = smov %s521_s16 }
  0xb8   : > { %s707_s16 = smov %s709_s19  ;;  %21 = sbr.rel (!%p19_p2) target bundleno = 11 (0xb), region = 69 }
  0xbd   :  { %250 = vsyncpa [#allocation6], 1 }
  0xbe   :  { %252 = vsyncpa [#allocation6 + $0x1], 1 }
  0xbf   :  { %253 = vsyncpa [#allocation7], 1 }
  0xc0   :  { %255 = vsyncpa [#allocation7 + $0x1], 1 }

</bundles_post_ra>
